<compile_context>
chip_gen: v7x
topology: tpu7x:2x2x1
jax: 0.10.0
libtpu: 0.0.40
codegen_flags: <defaults>
</compile_context>

<pallas_src>
import jax
import jax.numpy as jnp
from jax.experimental import pallas as pl
from jax.experimental.pallas import tpu as pltpu


def mlp_kernel(xt_ref,
               w1_ref, b1_ref,
               w2_ref, b2_ref,
               w3_ref, b3_ref,
               w4_ref, b4_ref,
               out_ref):
    mm = w1_ref.dtype  # bf16 matmul operand dtype

    # x tile arrives f32; cast on the VPU right before the MXU.
    xt = xt_ref[...].astype(mm)                                            # (V, BR)

    # (1) encoder + ReLU  (MXU bf16, f32 accumulate; elementwise stays f32)
    h = jnp.dot(w1_ref[...], xt, preferred_element_type=jnp.float32)       # (EMB, BR)
    h = jnp.maximum(h + b1_ref[...], 0.0)

    # (2) hidden + ReLU
    h = jnp.dot(w2_ref[...], h.astype(mm), preferred_element_type=jnp.float32)  # (HID, BR)
    h = jnp.maximum(h + b2_ref[...], 0.0)

    # (3) hidden2 + ReLU
    h = jnp.dot(w3_ref[...], h.astype(mm), preferred_element_type=jnp.float32)  # (RED, BR)
    h = jnp.maximum(h + b3_ref[...], 0.0)

    # (4) decoder + sigmoid.  out_rows = true out_size padded to a multiple
    # of 8 sublanes; padded rows are sliced off in the wrapper.
    logits = jnp.dot(w4_ref[...], h.astype(mm), preferred_element_type=jnp.float32)  # (OUTP, BR)
    out_ref[...] = jax.nn.sigmoid(logits + b4_ref[...]).astype(out_ref.dtype)


def prepare_params(params, matmul_dtype=jnp.bfloat16):
    """One-time layout/dtype preparation (do NOT call per forward pass).

    params: w{i} of shape (in, out) f32, b{i} of shape (1, out) f32.
    Returns (out, in) bf16 weights and (out, 1) f32 biases; the decoder's
    output dim is zero-padded up to a multiple of 8 sublanes.
    """
    out_size = params["w4"].shape[1]
    out_rows = 8 * pl.cdiv(out_size, 8)
    prepped = {"out_size": out_size}
    for i in (1, 2, 3, 4):
        w = jnp.asarray(params[f"w{i}"]).T               # (out, in)
        b = jnp.asarray(params[f"b{i}"]).reshape(-1, 1)  # (out, 1)
        if i == 4 and out_rows != out_size:
            w = jnp.pad(w, ((0, out_rows - out_size), (0, 0)))
            b = jnp.pad(b, ((0, out_rows - out_size), (0, 0)))
        prepped[f"w{i}"] = w.astype(matmul_dtype)
        prepped[f"b{i}"] = b.astype(jnp.float32)
    return prepped


def mlp_forward(x, prepped, *, max_block_rows=1024):
    """x: (N, in_size) f32 -> (N, out_size) f32 sigmoid probabilities."""
    n, in_size = x.shape
    out_size = prepped["out_size"]
    out_rows = prepped["w4"].shape[0]

    # --- batch tiling: even step count (v7x's 2 TCs), 128-lane-aligned tiles.
    steps = pl.cdiv(n, max_block_rows)
    steps = max(2, steps + (steps % 2))
    block_rows = 128 * pl.cdiv(pl.cdiv(n, steps), 128)
    n_pad = block_rows * steps

    # Batch goes on the lane axis: feed the kernel x^T (in_size, n_pad) in f32
    # (the bf16 cast happens inside the kernel, not in an extra HBM pass).
    xt = jnp.pad(x, ((0, n_pad - n), (0, 0))).T

    vmem = pltpu.MemorySpace.VMEM
    # Weights/biases: full-array blocks, constant index_map -> VMEM-resident.
    resident = lambda a: pl.BlockSpec(a.shape, lambda i: (0, 0), memory_space=vmem)

    weight_keys = ("w1", "b1", "w2", "b2", "w3", "b3", "w4", "b4")
    in_specs = [pl.BlockSpec((in_size, block_rows), lambda i: (0, i),
                             memory_space=vmem)]
    in_specs += [resident(prepped[k]) for k in weight_keys]

    out_t = pl.pallas_call(
        mlp_kernel,
        out_shape=jax.ShapeDtypeStruct((out_rows, n_pad), jnp.float32),
        grid=(steps,),
        in_specs=in_specs,
        out_specs=pl.BlockSpec((out_rows, block_rows), lambda i: (0, i),
                               memory_space=vmem),
        compiler_params=pltpu.CompilerParams(
            dimension_semantics=("parallel",)),   # batch axis -> both v7x TCs
    )(xt, *(prepped[k] for k in weight_keys))

    # Strip padded sublane rows / batch columns; back to (N, out_size).
    return out_t[:out_size, :n].T


def init_params(key, in_size, embed_size, dim_hidden, reduced_dim_hidden, out_size):
    """Deterministic init mimicking nn.Linear's U(-1/sqrt(fan_in), 1/sqrt(fan_in))."""
    dims = [(in_size, embed_size),
            (embed_size, dim_hidden),
            (dim_hidden, reduced_dim_hidden),
            (reduced_dim_hidden, out_size)]
    params = {}
    for i, (fan_in, fan_out) in enumerate(dims, start=1):
        key, kw, kb = jax.random.split(key, 3)
        bound = 1.0 / (fan_in ** 0.5)
        params[f"w{i}"] = jax.random.uniform(
            kw, (fan_in, fan_out), jnp.float32, minval=-bound, maxval=bound)
        params[f"b{i}"] = jax.random.uniform(
            kb, (1, fan_out), jnp.float32, minval=-bound, maxval=bound)
    return params


if __name__ == "__main__":
    # config: in_size (vocab) = 32, embed = 32, hidden = 32, reduced hidden = 16, out = 1
    # N = 520 -> 2 grid steps of 384 rows each (even step count, 128-aligned).
    N, IN, EMB, HID, RED, OUT = 520, 32, 32, 32, 16, 1

    key = jax.random.PRNGKey(0)
    key, kx = jax.random.split(key)
    x = jax.random.uniform(kx, (N, IN), jnp.float32)  # bag-of-words-like input

    params = init_params(key, IN, EMB, HID, RED, OUT)
    prepped = prepare_params(params)       # one-time bf16/transpose/pad prep

    out = mlp_forward(x, prepped)
    out = jax.block_until_ready(out)

    # sanity check against pure-JAX f32 reference (kernel matmuls are bf16,
    # so compare with a loose-but-safe tolerance)
    def ref(x, p):
        h = jnp.maximum(x @ p["w1"] + p["b1"], 0.0)
        h = jnp.maximum(h @ p["w2"] + p["b2"], 0.0)
        h = jnp.maximum(h @ p["w3"] + p["b3"], 0.0)
        return jax.nn.sigmoid(h @ p["w4"] + p["b4"])

    expected = ref(x, params)
    assert out.shape == (N, OUT)
    assert jnp.all(jnp.isfinite(out))
    assert jnp.allclose(out, expected, atol=2e-2, rtol=2e-2), (
        float(jnp.max(jnp.abs(out - expected))))
    print("KERNEL_OK")
</pallas_src>

<mosaic_0001>
module attributes {stable_mosaic.version = 11 : i64} {
  func.func @mlp_kernel(%arg0: i32, %arg1: memref<32x384xf32, #tpu.memory_space<vmem>>, %arg2: memref<32x32xbf16, #tpu.memory_space<vmem>>, %arg3: memref<32x1xf32, #tpu.memory_space<vmem>>, %arg4: memref<32x32xbf16, #tpu.memory_space<vmem>>, %arg5: memref<32x1xf32, #tpu.memory_space<vmem>>, %arg6: memref<16x32xbf16, #tpu.memory_space<vmem>>, %arg7: memref<16x1xf32, #tpu.memory_space<vmem>>, %arg8: memref<8x16xbf16, #tpu.memory_space<vmem>>, %arg9: memref<8x1xf32, #tpu.memory_space<vmem>>, %arg10: memref<8x384xf32, #tpu.memory_space<vmem>>) attributes {dimension_semantics = [#tpu.dimension_semantics<parallel>], iteration_bounds = array<i64: 2>, scalar_prefetch = 0 : i64, scratch_operands = 0 : i64, tpu.core_type = #tpu.core_type<tc>, window_params = [{transform_indices = @transform_0, window_bounds = array<i64: 32, 384>}, {pipeline_mode = #tpu.pipeline_mode<synchronous>, transform_indices = @transform_1, window_bounds = array<i64: 32, 32>}, {pipeline_mode = #tpu.pipeline_mode<synchronous>, transform_indices = @transform_2, window_bounds = array<i64: 32, 1>}, {pipeline_mode = #tpu.pipeline_mode<synchronous>, transform_indices = @transform_3, window_bounds = array<i64: 32, 32>}, {pipeline_mode = #tpu.pipeline_mode<synchronous>, transform_indices = @transform_4, window_bounds = array<i64: 32, 1>}, {pipeline_mode = #tpu.pipeline_mode<synchronous>, transform_indices = @transform_5, window_bounds = array<i64: 16, 32>}, {pipeline_mode = #tpu.pipeline_mode<synchronous>, transform_indices = @transform_6, window_bounds = array<i64: 16, 1>}, {pipeline_mode = #tpu.pipeline_mode<synchronous>, transform_indices = @transform_7, window_bounds = array<i64: 8, 16>}, {pipeline_mode = #tpu.pipeline_mode<synchronous>, transform_indices = @transform_8, window_bounds = array<i64: 8, 1>}, {transform_indices = @transform_9, window_bounds = array<i64: 8, 384>}]} {
    %c0 = arith.constant 0 : index
    %c0_0 = arith.constant 0 : index
    %0 = vector.load %arg1[%c0, %c0_0] : memref<32x384xf32, #tpu.memory_space<vmem>>, vector<32x384xf32>
    %1 = arith.truncf %0 : vector<32x384xf32> to vector<32x384xbf16>
    %c0_1 = arith.constant 0 : index
    %c0_2 = arith.constant 0 : index
    %2 = vector.load %arg2[%c0_1, %c0_2] : memref<32x32xbf16, #tpu.memory_space<vmem>>, vector<32x32xbf16>
    %cst = arith.constant dense<0.000000e+00> : vector<32x384xf32>
    %3 = tpu.matmul %2, %1, %cst {dimension_numbers = #tpu.dot_dimension_numbers<[1], [0], [0], [1], [0, 0, 1, 1], [], []>} : vector<32x32xbf16>, vector<32x384xbf16>, vector<32x384xf32> -> vector<32x384xf32>
    %c0_3 = arith.constant 0 : index
    %c0_4 = arith.constant 0 : index
    %4 = vector.load %arg3[%c0_3, %c0_4] : memref<32x1xf32, #tpu.memory_space<vmem>>, vector<32x1xf32>
    %5 = vector.broadcast %4 : vector<32x1xf32> to vector<32x384xf32>
    %6 = arith.addf %3, %5 : vector<32x384xf32>
    %cst_5 = arith.constant 0.000000e+00 : f32
    %7 = vector.broadcast %cst_5 : f32 to vector<32x384xf32>
    %8 = arith.maximumf %6, %7 : vector<32x384xf32>
    %c0_6 = arith.constant 0 : index
    %c0_7 = arith.constant 0 : index
    %9 = vector.load %arg4[%c0_6, %c0_7] : memref<32x32xbf16, #tpu.memory_space<vmem>>, vector<32x32xbf16>
    %10 = arith.truncf %8 : vector<32x384xf32> to vector<32x384xbf16>
    %cst_8 = arith.constant dense<0.000000e+00> : vector<32x384xf32>
    %11 = tpu.matmul %9, %10, %cst_8 {dimension_numbers = #tpu.dot_dimension_numbers<[1], [0], [0], [1], [0, 0, 1, 1], [], []>} : vector<32x32xbf16>, vector<32x384xbf16>, vector<32x384xf32> -> vector<32x384xf32>
    %c0_9 = arith.constant 0 : index
    %c0_10 = arith.constant 0 : index
    %12 = vector.load %arg5[%c0_9, %c0_10] : memref<32x1xf32, #tpu.memory_space<vmem>>, vector<32x1xf32>
    %13 = vector.broadcast %12 : vector<32x1xf32> to vector<32x384xf32>
    %14 = arith.addf %11, %13 : vector<32x384xf32>
    %cst_11 = arith.constant 0.000000e+00 : f32
    %15 = vector.broadcast %cst_11 : f32 to vector<32x384xf32>
    %16 = arith.maximumf %14, %15 : vector<32x384xf32>
    %c0_12 = arith.constant 0 : index
    %c0_13 = arith.constant 0 : index
    %17 = vector.load %arg6[%c0_12, %c0_13] : memref<16x32xbf16, #tpu.memory_space<vmem>>, vector<16x32xbf16>
    %18 = arith.truncf %16 : vector<32x384xf32> to vector<32x384xbf16>
    %cst_14 = arith.constant dense<0.000000e+00> : vector<16x384xf32>
    %19 = tpu.matmul %17, %18, %cst_14 {dimension_numbers = #tpu.dot_dimension_numbers<[1], [0], [0], [1], [0, 0, 1, 1], [], []>} : vector<16x32xbf16>, vector<32x384xbf16>, vector<16x384xf32> -> vector<16x384xf32>
    %c0_15 = arith.constant 0 : index
    %c0_16 = arith.constant 0 : index
    %20 = vector.load %arg7[%c0_15, %c0_16] : memref<16x1xf32, #tpu.memory_space<vmem>>, vector<16x1xf32>
    %21 = vector.broadcast %20 : vector<16x1xf32> to vector<16x384xf32>
    %22 = arith.addf %19, %21 : vector<16x384xf32>
    %cst_17 = arith.constant 0.000000e+00 : f32
    %23 = vector.broadcast %cst_17 : f32 to vector<16x384xf32>
    %24 = arith.maximumf %22, %23 : vector<16x384xf32>
    %c0_18 = arith.constant 0 : index
    %c0_19 = arith.constant 0 : index
    %25 = vector.load %arg8[%c0_18, %c0_19] : memref<8x16xbf16, #tpu.memory_space<vmem>>, vector<8x16xbf16>
    %26 = arith.truncf %24 : vector<16x384xf32> to vector<16x384xbf16>
    %cst_20 = arith.constant dense<0.000000e+00> : vector<8x384xf32>
    %27 = tpu.matmul %25, %26, %cst_20 {dimension_numbers = #tpu.dot_dimension_numbers<[1], [0], [0], [1], [0, 0, 1, 1], [], []>} : vector<8x16xbf16>, vector<16x384xbf16>, vector<8x384xf32> -> vector<8x384xf32>
    %c0_21 = arith.constant 0 : index
    %c0_22 = arith.constant 0 : index
    %28 = vector.load %arg9[%c0_21, %c0_22] : memref<8x1xf32, #tpu.memory_space<vmem>>, vector<8x1xf32>
    %29 = vector.broadcast %28 : vector<8x1xf32> to vector<8x384xf32>
    %30 = arith.addf %27, %29 : vector<8x384xf32>
    %31 = arith.negf %30 : vector<8x384xf32>
    %32 = math.exp %31 : vector<8x384xf32>
    %cst_23 = arith.constant 1.000000e+00 : f32
    %33 = vector.broadcast %cst_23 : f32 to vector<8x384xf32>
    %34 = arith.addf %33, %32 : vector<8x384xf32>
    %35 = arith.divf %33, %34 : vector<8x384xf32>
    %c0_24 = arith.constant 0 : index
    %c0_25 = arith.constant 0 : index
    %36 = vector.load %arg10[%c0_24, %c0_25] : memref<8x384xf32, #tpu.memory_space<vmem>>, vector<8x384xf32>
    tpu.vector_store %arg10[%c0_24, %c0_25], %35 {strides = array<i32>} : memref<8x384xf32, #tpu.memory_space<vmem>>, vector<8x384xf32>,
    return
  }
  func.func @transform_0(%arg0: i32) -> (i32, i32) {
    %c0_i32 = arith.constant 0 : i32
    %c0_i32_0 = arith.constant 0 : i32
    return %c0_i32, %arg0 : i32, i32
  }
  func.func @transform_1(%arg0: i32) -> (i32, i32) {
    %c0_i32 = arith.constant 0 : i32
    %c0_i32_0 = arith.constant 0 : i32
    %c0_i32_1 = arith.constant 0 : i32
    return %c0_i32, %c0_i32_0 : i32, i32
  }
  func.func @transform_2(%arg0: i32) -> (i32, i32) {
    %c0_i32 = arith.constant 0 : i32
    %c0_i32_0 = arith.constant 0 : i32
    %c0_i32_1 = arith.constant 0 : i32
    return %c0_i32, %c0_i32_0 : i32, i32
  }
  func.func @transform_3(%arg0: i32) -> (i32, i32) {
    %c0_i32 = arith.constant 0 : i32
    %c0_i32_0 = arith.constant 0 : i32
    %c0_i32_1 = arith.constant 0 : i32
    return %c0_i32, %c0_i32_0 : i32, i32
  }
  func.func @transform_4(%arg0: i32) -> (i32, i32) {
    %c0_i32 = arith.constant 0 : i32
    %c0_i32_0 = arith.constant 0 : i32
    %c0_i32_1 = arith.constant 0 : i32
    return %c0_i32, %c0_i32_0 : i32, i32
  }
  func.func @transform_5(%arg0: i32) -> (i32, i32) {
    %c0_i32 = arith.constant 0 : i32
    %c0_i32_0 = arith.constant 0 : i32
    %c0_i32_1 = arith.constant 0 : i32
    return %c0_i32, %c0_i32_0 : i32, i32
  }
  func.func @transform_6(%arg0: i32) -> (i32, i32) {
    %c0_i32 = arith.constant 0 : i32
    %c0_i32_0 = arith.constant 0 : i32
    %c0_i32_1 = arith.constant 0 : i32
    return %c0_i32, %c0_i32_0 : i32, i32
  }
  func.func @transform_7(%arg0: i32) -> (i32, i32) {
    %c0_i32 = arith.constant 0 : i32
    %c0_i32_0 = arith.constant 0 : i32
    %c0_i32_1 = arith.constant 0 : i32
    return %c0_i32, %c0_i32_0 : i32, i32
  }
  func.func @transform_8(%arg0: i32) -> (i32, i32) {
    %c0_i32 = arith.constant 0 : i32
    %c0_i32_0 = arith.constant 0 : i32
    %c0_i32_1 = arith.constant 0 : i32
    return %c0_i32, %c0_i32_0 : i32, i32
  }
  func.func @transform_9(%arg0: i32) -> (i32, i32) {
    %c0_i32 = arith.constant 0 : i32
    %c0_i32_0 = arith.constant 0 : i32
    return %c0_i32, %arg0 : i32, i32
  }
}

</mosaic_0001>

<bundles_post_ra>
// kernel: tpu_custom_call.1
= control target key start
LH: loop header
LB: loop body
LE: loop exit
PB: predicated region body
PF: predicated region fallthrough
CT: control target
= control target key end

     0   :  { %14 = vsyncpa [#allocation3], 0  ;;  %s1545_s0 = inlined_call_operand.hbm [shape: f32[32,768], index: 0, kind: input, shape index: {}]   ;;  %s1546_s1 = inlined_call_operand.vmem [shape: bf16[32,32], index: 1, kind: input, shape index: {}]   ;;  %s1547_s2 = inlined_call_operand.vmem [shape: f32[32,1], index: 2, kind: input, shape index: {}]   ;;  %s1548_s3 = inlined_call_operand.vmem [shape: bf16[32,32], index: 3, kind: input, shape index: {}]   ;;  %s1549_s4 = inlined_call_operand.vmem [shape: f32[32,1], index: 4, kind: input, shape index: {}]   ;;  %s1550_s5 = inlined_call_operand.vmem [shape: bf16[16,32], index: 5, kind: input, shape index: {}]   ;;  %s1551_s6 = inlined_call_operand.vmem [shape: f32[16,1], index: 6, kind: input, shape index: {}]   ;;  %s1552_s7 = inlined_call_operand.vmem [shape: bf16[8,16], index: 7, kind: input, shape index: {}]   ;;  %s1553_s8 = inlined_call_operand.vmem [shape: f32[8,1], index: 8, kind: input, shape index: {}]   ;;  %s1554_s9 = inlined_call_operand.hbm [shape: f32[8,768], index: 9, kind: output, shape index: {}]  }
   0x1   :  { %16 = vsyncpa [#allocation3 + $0x1], 0 }
   0x2   :  { %17 = vsyncpa [#allocation4], 0 }
   0x3   :  { %19 = vsyncpa [#allocation4 + $0x1], 0  ;;  %s1317_s30 = smov 0   ;;  %s1319_s10 = smov 0  }
   0x4   :  { %s1321_s11 = smov 0   ;;  %s1323_s12 = smov 0  }
   0x5 LB: > { %s1338_s13 = sadd.s32 4294967295, %s1257_s12   ;;  %s1014_s14 = sadd.s32 4294967294, %s1257_s12   ;;  %s1257_s12 = sphi %s1323_s12, %s1569_s12   ;;  %s1253_s11 = sphi %s1321_s11, %s1568_s11   ;;  %s1249_s10 = sphi %s1319_s10, %s1567_s10   ;;  %s1245_s30 = sphi %s1317_s30, %s1566_s30  }
   0x6   : > { %s1342_s15 = sadd.s32 1, %s1257_s12   ;;  %s32_s16 = sadd.s32 1, %s1253_s11 }
   0x7   : > { %s29_s17 = ssub.s32 %s1257_s12, %s1342_s15  ;;  %p39_p0 = scmp.ne.s32.totalorder %s1253_s11, %s1249_s10 }
   0x8   : > { %p30_p1 = scmp.eq.s32.totalorder %s29_s17, 0  ;;  %p40_p2 = scmp.eq.s32.totalorder %s1257_s12, 0 }
   0x9   : > { %p45_p3 = scmp.ne.s32.totalorder %s1249_s10, %s1245_s30  ;;  %p46_p4 = scmp.eq.s32.totalorder %s1338_s13, 0 }
   0xa   : > { %s1354_s18 = scalar_select %p30_p1, %s1253_s11, %s32_s16  }
   0xb   : > { %p41_p5 = por %p40_p2, %p39_p0  ;;  %p1356_p6 = por %p46_p4, %p45_p3 }
   0xc   : > { %1556 = sst [smem:[#allocation8_spill]] %s1354_s18  ;;  %p237_p7 = scmp.eq.s32.totalorder %s1338_s13, 1 }
   0xd   : > { %p243_p8 = scmp.eq.s32.totalorder %s1014_s14, 1  ;;  %p1102_p10 = scmp.lt.s32.totalorder %s1257_s12, 2 }
   0xe   : > { %p1363_p11 = por %p237_p7, %p39_p0  ;;  %s287_s22 = sand.u32 1, %s1253_s11  }
   0xf   : > { %p1367_p12 = por %p243_p8, %p45_p3  ;;  %s1042_s23 = smul.u32 384, %s1257_s12 }
  0x10   : > { %s1558_s20 = scalar_select %p1363_p11, 1, 0 }
  0x11   : > { %s1559_s21 = scalar_select %p1367_p12, 1, 0 }
  0x12   : > { %s1087_s24 = smul.u32 96, %s287_s22  ;;  %s1376_s27 = scalar_lea.hbm %s1545_s0, %s1042_s23 }
  0x13   : > { %p1378_p13 = pnand %p1102_p10, %p41_p5  ;;  %s1385_s16 = scalar_lea.sflag [#allocation3], %s287_s22 }
  0x14   : > { %s291_s29 = scalar_lea.vmem [#allocation2], %s1087_s24  ;;  %s1161_s17 = scalar_lea.hbm %s1376_s27, 1536 }
  0x15   : > { %s298_s14 = sshll.u32 %s291_s29, 4  ;;  %p1162_p1 = scmp.ne.s32.totalorder %s1376_s27, %s1161_s17  ;;  %s1382_s14 = int_to_ptr.vmem [resolvable:$true] %s298_s14 }
  0x16   : > { %p1163_p2 = pneg %p1378_p13  ;;  %s1166_s26 = scalar_lea.hbm %s1545_s0, 3072 }
  0x17   : > { %p1167_p5 = scmp.lt.u32.totalorder %s1376_s27, %s1545_s0  ;;  %p1168_p7 = scmp.lt.u32.totalorder %s1166_s26, %s1161_s17 }
  0x18   : > { %p1164_p3 = pnand %p1163_p2, %p1162_p1  ;;  %p1170_p10 = scmp.lt.u32.totalorder %s1161_s17, %s1376_s27 }
  0x19   : > { %p1169_p8 = por %p1168_p7, %p1167_p5 }
  0x1a   : > { %p1165_p4 = pneg %p1164_p3 }
  0x1b   : > { %p1171_p9 = por %p1170_p10, %p1169_p8 }
  0x1d   : > { %p1172_p0 = pnand %p1171_p9, %p1165_p4 }
  0x1f   : > { %1175 = shalt.err (!%p1172_p0)
}
  0x20   : > { %s1176_s22 = scalar_lea.vmem %s1382_s14, 1536  ;;  %s1259_s29 = smov [#allocation2]  }
  0x21   : > { %p1177_p1 = scmp.ne.s32.totalorder %s1382_s14, %s1176_s22  ;;  %s1181_s23 = sshll.u32 %s1259_s29, 4  ;;  %s1182_s23 = int_to_ptr.vmem [resolvable:$false] %s1181_s23 }
  0x22   : > { %s1183_s18 = scalar_lea.vmem %s1182_s23, 3072  ;;  %p1184_p11 = scmp.lt.s32.totalorder %s1382_s14, %s1182_s23 }
  0x23   : > { %p1179_p3 = pnand %p1177_p1, %p1163_p2  ;;  %p1185_p5 = scmp.lt.s32.totalorder %s1183_s18, %s1176_s22 }
  0x25   : > { %p1180_p12 = pneg %p1179_p3  ;;  %p1186_p7 = por %p1185_p5, %p1184_p11 }
  0x27   : > { %p1187_p8 = pnand %p1186_p7, %p1180_p12 }
  0x29   : > { %1190 = shalt.err (!%p1187_p8)
}
  0x2a   : > { %s1260_s17 = smov 768   ;;  %s1261_s25 = smov 384  }
  0x2b   : > { %s1262_s26 = smov 24   ;;  %p306_p9 = scmp.lt.s32.totalorder %s1257_s12, 3 }
  0x2c   : > { %1097 = dma.hbm_to_vmem [thread:$0]  (!%p1378_p13), %s1376_s27, 1536, %s1382_s14, %s1385_s16, %s1260_s17, %s1261_s25, %s1262_s26  }
  0x2d   : > { %p1561_p0 = scmp.ge.s32.totalorder %s1257_s12, 1 }
  0x2f   : > { %p307_p2 = pnand %p1561_p0, %p306_p9 }
  0x30   : > { %s1417_s24 = sand.u32 (!%p307_p2), 1, %s1249_s10  }
  0x31   : > { %310 = sbr.rel (%p307_p2) target bundleno = 1015 (0x3f7), region = 56  ;;  %s313_s29 = scalar_lea.sflag (!%p307_p2), [#allocation3], %s1417_s24 }
  0x32   : > { %s1088_s22 = smul.u32 (!%p307_p2), 96, %s1417_s24 }
  0x34   : > { %s316_s23 = scalar_lea.vmem (!%p307_p2), [#allocation2], %s1088_s22 }
  0x38   : > { %1236 = dma.done.wait (%p1356_p6), %s313_s29, 1536  }
  0x39   : > { %1238 = vsyncadd (%p1356_p6), %s313_s29, 4294965760  ;;  %v1263_v0 = vmov 0   ;;  %v355_v1 = vld [vmem:[%s316_s23 + $0x8] sm:$0xff]  ;;  %v358_v2 = vld [vmem:[%s316_s23 + $0x20] sm:$0xff]  ;;  %vm410_vm0 = vcmask 261120   ;;  %vm1265_vm1 = vmmov 0  }
  0x3a   : > { %449 = vmatprep.mubr.bf16.mxu0 %v1263_v0  ;;  %1142 = vset.pattern.permute.xlu0 %v1263_v0  ;;  %v356_v3 = vld [vmem:[%s316_s23 + $0x10] sm:$0xff]  ;;  %v367_v4 = vpack.c.bf16 %v358_v2, %v355_v1  ;;  %v359_v5 = vld [vmem:[%s316_s23 + $0x28] sm:$0xff]  ;;  %v354_v6 = vld [vmem:[%s316_s23] sm:$0xff]  ;;  %vm823_vm2 = vcmask 130048   ;;  %s1089_s29 = smul.u32 24, %s1417_s24  ;;  %s930_s18 = scalar_lea.sflag [#allocation4], %s1417_s24 }
  0x3b   : > { %1143 = vset.pattern.permute.xlu1 %v1263_v0  ;;  %v357_v7 = vld [vmem:[%s316_s23 + $0x18] sm:$0xff]  ;;  %v368_v8 = vpack.c.bf16 %v359_v5, %v356_v3  ;;  %v364_v11 = vld [vmem:[%s316_s23 + $0x50] sm:$0xff]  ;;  %v362_v12 = vld [vmem:[%s316_s23 + $0x40] sm:$0xff]  ;;  %s1043_s19 = smul.u32 384, %s1338_s13  ;;  %p1562_p11 = scmp.ne.s32.totalorder %s1558_s20, 0 }
  0x3c   : > { %v366_v9 = vpack.c.bf16 %v357_v7, %v354_v6  ;;  %v361_v10 = vld [vmem:[%s316_s23 + $0x38] sm:$0xff]  ;;  %417 = vmatprep.subr.bf16.mxu0 %v367_v4  ;;  %v360_v15 = vld [vmem:[%s316_s23 + $0x30] sm:$0xff]  ;;  %v363_v16 = vld [vmem:[%s316_s23 + $0x48] sm:$0xff]  ;;  %s1266_s13 = smov [#allocation5]  }
  0x3d   : > { %v370_v13 = vpack.c.bf16 %v364_v11, %v361_v10  ;;  %v365_v14 = vld [vmem:[%s316_s23 + $0x58] sm:$0xff]  ;;  %1057 = vmatprep.subr.bf16.mxu1 %v368_v8  ;;  %v369_v18 = vpack.c.bf16 %v363_v16, %v360_v15  ;;  %v1144_v19 = vld [vmem:[%s1546_s1] sm:$0xff]   ;;  %v378_v21 = vld [vmem:[%s1547_s2 + $0x10] sm:$0xff]  ;;  %s350_s23 = scalar_lea.vmem [#allocation5], %s1089_s29  ;;  %s1501_s16 = scalar_lea.hbm %s1554_s9, %s1043_s19 }
  0x3e   : > { %418 = vmatpush1.bf16.msra.mxu0 %v366_v9  ;;  %v371_v17 = vpack.c.bf16 %v365_v14, %v362_v12  ;;  %1058 = vmatpush3.bf16.msra.mxu1 %v368_v8  ;;  %v376_v20 = vld [vmem:[%s1547_s2] sm:$0xff]  ;;  %v1145_v22 = vld [vmem:[%s1546_s1 + $0x8] sm:$0xff]   ;;  %v379_v24 = vld [vmem:[%s1547_s2 + $0x18] sm:$0xff]  ;;  %s944_s27 = sshll.u32 %s350_s23, 4  ;;  %s1195_s25 = sshll.u32 %s1266_s13, 4  ;;  %s1503_s27 = int_to_ptr.vmem [resolvable:$true] %s944_s27  ;;  %s1196_s25 = int_to_ptr.vmem [resolvable:$false] %s1195_s25 }
  0x3f   : > { %419 = vmatprep.subr.bf16.mxu0 %v370_v13  ;;  %1061 = vmatprep.mubr.msk.bf16.mxu1 %vm410_vm0, %v1144_v19  ;;  %v377_v23 = vld [vmem:[%s1547_s2 + $0x8] sm:$0xff]  ;;  %v541_v25 = vld [vmem:[%s1549_s4] sm:$0xff]  ;;  %v543_v27 = vld [vmem:[%s1549_s4 + $0x10] sm:$0xff]  ;;  %s1191_s17 = scalar_lea.vmem %s1503_s27, 384  ;;  %s1197_s26 = scalar_lea.vmem %s1196_s25, 768 }
  0x40   : > { %1059 = vmatprep.subr.bf16.mxu1 %v371_v17  ;;  %382 = vperm.xlu0 %1142, %v376_v20   ;;  %v542_v26 = vld [vmem:[%s1549_s4 + $0x8] sm:$0xff]  ;;  %v544_v28 = vld [vmem:[%s1549_s4 + $0x18] sm:$0xff]  ;;  %v703_v29 = vld [vmem:[%s1551_s6] sm:$0xff]  ;;  %p1192_p6 = scmp.ne.s32.totalorder %s1503_s27, %s1191_s17  ;;  %p1198_p4 = scmp.lt.s32.totalorder %s1503_s27, %s1196_s25 }
  0x41   : > { %392 = vperm.xlu1 %1143, %v378_v21   ;;  %v704_v30 = vld [vmem:[%s1551_s6 + $0x8] sm:$0xff]  ;;  %v817_v31 = vld [vmem:[%s1553_s8] sm:$0xff]  ;;  %p1199_p10 = scmp.lt.s32.totalorder %s1197_s26, %s1191_s17 }
  0x42   : > { %420 = vmatpush1.bf16.msra.mxu0 %v369_v18  ;;  %1060 = vmatpush3.bf16.msra.mxu1 %v371_v17  ;;  %v1146_v32 = vld [vmem:[%s1548_s3] sm:$0xff]   ;;  %v1147_v15 = vld [vmem:[%s1548_s3 + $0x8] sm:$0xff]   ;;  %v1264_v17 = vmov 0.0   ;;  %p1193_p12 = pnand %p1192_p6, %p1562_p11 }
  0x43   : > { %p1200_p1 = por %p1199_p10, %p1198_p4 }
  0x44   : > { %387 = vperm.xlu0 %1142, %v377_v23   ;;  %p1194_p13 = pneg %p1193_p12 }
  0x45   : > { %1021 = vmatmul.mubr.msk.bf16.vlgmr.msra.gmra.mrb[0].mxu0 %vm410_vm0, %v1144_v19  ;;  %1062 = vmatmul.mubr.msk.bf16.vlgmr.msra.gmra.mrb[0].mxu1 %vm410_vm0, %v1145_v22 }
  0x46   : > { %459 = vmatprep.mubr.bf16.mxu0 %v1263_v0  ;;  %397 = vperm.xlu1 %1143, %v379_v24   ;;  %p1201_p3 = pnand %p1200_p1, %p1194_p13 }
  0x47   : > { %613 = vmatprep.mubr.bf16.mxu1 %v1263_v0 }
  0x48   : > { %547 = vperm.xlu0 %1142, %v541_v25  }
  0x4a   : > { %552 = vperm.xlu1 %1143, %v542_v26  }
  0x4c   : > { %557 = vperm.xlu0 %1142, %v543_v27  }
  0x4d   : > { %1022 = vmatmul.mubr.msk.bf16.gmra.mrb[4].mxu0 %vm410_vm0, %v1145_v22 }
  0x4e   : > { %562 = vperm.xlu1 %1143, %v544_v28   ;;  %1069 = vmatprep.mubr.msk.bf16.mxu0 %vm410_vm0, %v1146_v32 }
  0x50   : > { %707 = vperm.xlu0 %1142, %v703_v29  }
  0x52   : > { %712 = vperm.xlu1 %1143, %v704_v30  }
  0x54   : > { %820 = vperm.xlu0 %1142, %v817_v31  }
  0xbf   : > { %v383_v33 = vpop.permute.xlu0 %382 }
  0xc0   : > { %v393_v34 = vpop.permute.xlu1 %392 }
  0xc3   : > { %v388_v35 = vpop.permute.xlu0 %387 }
  0xc5   : > { %v398_v36 = vpop.permute.xlu1 %397 }
  0xc7   : > { %v548_v18 = vpop.permute.xlu0 %547 }
  0xc9   : > { %v553_v19 = vpop.permute.xlu1 %552 }
  0xcb   : > { %v558_v20 = vpop.permute.xlu0 %557 }
  0xcd   : > { %v563_v24 = vpop.permute.xlu1 %562 }
 0x118   : > { %v451_v37 = vpop.f32.mrb[0].mxu0  ;;  %v1063_v39 = vpop.f32.mrb[0].mxu1 }
 0x119   : > { %v452_v38 = vadd.f32 %v451_v37, %v383_v33  ;;  %v453_v40 = vpop.f32.mrb[1].mxu0  ;;  %v513_v41 = vadd.f32 %v1063_v39, %v393_v34  ;;  %v504_v43 = vpop.f32.mrb[1].mxu1 }
 0x11a   : > { %v454_v42 = vadd.f32 %v453_v40, %v383_v33  ;;  %v455_v44 = vpop.f32.mrb[2].mxu0  ;;  %v505_v45 = vadd.f32 %v504_v43, %v383_v33  ;;  %v1064_v47 = vpop.f32.mrb[2].mxu1 }
 0x11b   : > { %v456_v46 = vadd.f32 %v455_v44, %v388_v35  ;;  %v457_v48 = vpop.f32.mrb[3].mxu0  ;;  %v527_v49 = vmax.f32 %v513_v41, 0.0  ;;  %v516_v50 = vadd.f32 %v1064_v47, %v398_v36  ;;  %v507_v52 = vpop.f32.mrb[3].mxu1  ;;  %v519_v53 = vmax.f32 %v452_v38, 0.0 }
 0x11c   : > { %v458_v51 = vadd.f32 %v457_v48, %v388_v35  ;;  %v521_v54 = vmax.f32 %v505_v45, 0.0  ;;  %v508_v56 = vadd.f32 %v507_v52, %v388_v35  ;;  %v520_v57 = vmax.f32 %v454_v42, 0.0 }
 0x11d   : > { %v522_v55 = vmax.f32 %v456_v46, 0.0  ;;  %v530_v58 = vmax.f32 %v516_v50, 0.0 }
 0x11e   : > { %v523_v59 = vmax.f32 %v458_v51, 0.0  ;;  %v524_v61 = vmax.f32 %v508_v56, 0.0 }
 0x11f   : > { %v535_v60 = vpack.c.bf16 %v522_v55, %v519_v53  ;;  %v540_v62 = vpack.c.bf16 %v530_v58, %v527_v49  ;;  %v1148_v55 = vld [vmem:[%s1550_s5] sm:$0xff]  }
 0x120   : > { %v536_v63 = vpack.c.bf16 %v523_v59, %v520_v57  ;;  %v461_v1 = vpop.f32.mrb[4].mxu0  ;;  %v537_v2 = vpack.c.bf16 %v524_v61, %v521_v54 }
 0x121   : > { %v462_v3 = vadd.f32 %v461_v1, %v393_v34  ;;  %v463_v4 = vpop.f32.mrb[5].mxu0 }
 0x122   : > { %v464_v5 = vadd.f32 %v463_v4, %v393_v34  ;;  %v465_v6 = vpop.f32.mrb[6].mxu0  ;;  %581 = vmatprep.subr.bf16.mxu1 %v536_v63  ;;  %1065 = vmatprep.subr.bf16.mxu0 %v537_v2 }
 0x123   : > { %v466_v7 = vadd.f32 %v465_v6, %v398_v36  ;;  %v467_v8 = vpop.f32.mrb[7].mxu0  ;;  %582 = vmatpush1.bf16.msra.mxu1 %v535_v60  ;;  %1066 = vmatpush3.bf16.msra.mxu0 %v537_v2  ;;  %v525_v10 = vmax.f32 %v462_v3, 0.0  ;;  %v708_v2 = vpop.permute.xlu0 %707 }
 0x124   : > { %v468_v9 = vadd.f32 %v467_v8, %v398_v36  ;;  %1067 = vmatprep.subr.bf16.mxu0 %v540_v62  ;;  %v526_v12 = vmax.f32 %v464_v5, 0.0  ;;  %v713_v6 = vpop.permute.xlu1 %712 }
 0x125   : > { %v528_v11 = vmax.f32 %v466_v7, 0.0 }
 0x126   : > { %v529_v13 = vmax.f32 %v468_v9, 0.0 }
 0x127   : > { %v538_v14 = vpack.c.bf16 %v528_v11, %v525_v10  ;;  %1068 = vmatpush3.bf16.msra.mxu0 %v540_v62 }
 0x128   : > { %v539_v16 = vpack.c.bf16 %v529_v13, %v526_v12 }
 0x12a   : > { %583 = vmatprep.subr.bf16.mxu1 %v539_v16  ;;  %1070 = vmatmul.mubr.msk.bf16.vlgmr.msra.gmra.mrb[8].mxu0 %vm410_vm0, %v1147_v15  ;;  %v813_v16 = vld [vmem:[%s1552_s7] sm:$0xf] }
 0x12b   : > { %584 = vmatpush1.bf16.msra.mxu1 %v538_v14  ;;  %755 = vmatprep.mubr.bf16.mxu0 %v1263_v0 }
 0x12c   : > { %1073 = vmatprep.subr.bf16.mxu1 %v1264_v17 }
 0x12e   : > { %1027 = vmatmul.mubr.msk.bf16.vlgmr.msra.gmra.mrb[4].mxu1 %vm410_vm0, %v1146_v32 }
 0x12f   : > { %623 = vmatprep.mubr.bf16.mxu1 %v1263_v0 }
 0x136   : > { %1028 = vmatmul.mubr.msk.bf16.gmra.mrb[8].mxu1 %vm410_vm0, %v1147_v15 }
 0x137   : > { %1077 = vmatprep.mubr.msk.bf16.mxu1 %vm1265_vm1, %v1264_v17 }
 0x1fd   : > { %v1071_v21 = vpop.f32.mrb[8].mxu0 }
 0x1fe   : > { %v677_v22 = vadd.f32 %v1071_v21, %v558_v20  ;;  %v668_v23 = vpop.f32.mrb[9].mxu0 }
 0x1ff   : > { %v669_v25 = vadd.f32 %v668_v23, %v548_v18  ;;  %v1072_v26 = vpop.f32.mrb[10].mxu0 }
 0x200   : > { %v680_v27 = vadd.f32 %v1072_v26, %v563_v24  ;;  %v671_v28 = vpop.f32.mrb[11].mxu0  ;;  %v691_v33 = vmax.f32 %v677_v22, 0.0 }
 0x201   : > { %v615_v29 = vpop.f32.mrb[4].mxu1  ;;  %v672_v30 = vadd.f32 %v671_v28, %v553_v19  ;;  %v685_v37 = vmax.f32 %v669_v25, 0.0 }
 0x202   : > { %v616_v31 = vadd.f32 %v615_v29, %v548_v18  ;;  %v617_v32 = vpop.f32.mrb[5].mxu1  ;;  %v694_v34 = vmax.f32 %v680_v27, 0.0  ;;  %v821_v27 = vpop.permute.xlu0 %820 }
 0x203   : > { %v618_v35 = vadd.f32 %v617_v32, %v548_v18  ;;  %v619_v36 = vpop.f32.mrb[6].mxu1  ;;  %v688_v38 = vmax.f32 %v672_v30, 0.0 }
 0x204   : > { %v620_v39 = vadd.f32 %v619_v36, %v553_v19  ;;  %v621_v40 = vpop.f32.mrb[7].mxu1  ;;  %v702_v41 = vpack.c.bf16 %v694_v34, %v691_v33  ;;  %v683_v44 = vmax.f32 %v616_v31, 0.0 }
 0x205   : > { %v622_v42 = vadd.f32 %v621_v40, %v553_v19  ;;  %v699_v43 = vpack.c.bf16 %v688_v38, %v685_v37  ;;  %v684_v46 = vmax.f32 %v618_v35, 0.0 }
 0x206   : > { %v686_v45 = vmax.f32 %v620_v39, 0.0 }
 0x207   : > { %v687_v47 = vmax.f32 %v622_v42, 0.0  ;;  %1074 = vmatpush3.bf16.msra.mxu1 %v699_v43 }
 0x208   : > { %v697_v48 = vpack.c.bf16 %v686_v45, %v683_v44  ;;  %1075 = vmatprep.subr.bf16.mxu1 %v1264_v17 }
 0x209   : > { %v698_v49 = vpack.c.bf16 %v687_v47, %v684_v46  ;;  %v625_v50 = vpop.f32.mrb[8].mxu1 }
 0x20a   : > { %v626_v51 = vadd.f32 %v625_v50, %v558_v20  ;;  %v627_v52 = vpop.f32.mrb[9].mxu1 }
 0x20b   : > { %v628_v53 = vadd.f32 %v627_v52, %v558_v20  ;;  %v629_v54 = vpop.f32.mrb[10].mxu1  ;;  %723 = vmatprep.subr.bf16.mxu0 %v698_v49  ;;  %1076 = vmatpush3.bf16.msra.mxu1 %v702_v41 }
 0x20c   : > { %v630_v56 = vadd.f32 %v629_v54, %v563_v24  ;;  %v631_v57 = vpop.f32.mrb[11].mxu1  ;;  %724 = vmatpush1.bf16.msra.mxu0 %v697_v48  ;;  %1081 = vmatprep.subr.bf16.mxu1 %v1264_v17  ;;  %v689_v59 = vmax.f32 %v626_v51, 0.0 }
 0x20d   : > { %v632_v58 = vadd.f32 %v631_v57, %v563_v24  ;;  %v690_v61 = vmax.f32 %v628_v53, 0.0 }
 0x20e   : > { %v692_v60 = vmax.f32 %v630_v56, 0.0  ;;  %1078 = vmatmul.mubr.msk.bf16.vlgmr.msra.gmra.mrb[12].mxu1 %vm410_vm0, %v1148_v55 }
 0x20f   : > { %v693_v62 = vmax.f32 %v632_v58, 0.0  ;;  %1083 = vmatprep.mubr.msk.bf16.mxu1 %vm1265_vm1, %v1264_v17 }
 0x210   : > { %v700_v63 = vpack.c.bf16 %v692_v60, %v689_v59 }
 0x211   : > { %v701_v1 = vpack.c.bf16 %v693_v62, %v690_v61 }
 0x213   : > { %725 = vmatprep.subr.bf16.mxu0 %v701_v1 }
 0x214   : > { %726 = vmatpush1.bf16.msra.mxu0 %v700_v63 }
 0x217   : > { %1032 = vmatmul.mubr.msk.bf16.vlgmr.msra.gmra.mrb[12].mxu0 %vm410_vm0, %v1148_v55 }
 0x218   : > { %859 = vmatprep.mubr.bf16.mxu0 %v1263_v0 }
 0x2e1   : > { %v800_v3 = vpop.f32.mrb[12].mxu1 }
 0x2e2   : > { %v801_v4 = vadd.f32 %v800_v3, %v708_v2  ;;  %v1079_v5 = vpop.f32.mrb[13].mxu1 }
 0x2e3   : > { %v803_v7 = vpop.f32.mrb[14].mxu1 }
 0x2e4   : > { %v804_v8 = vadd.f32 %v803_v7, %v713_v6  ;;  %v1080_v9 = vpop.f32.mrb[15].mxu1  ;;  %v809_v10 = vmax.f32 %v801_v4, 0.0 }
 0x2e6   : > { %v812_v11 = vmax.f32 %v804_v8, 0.0 }
 0x2e8   : > { %v816_v12 = vpack.c.bf16 %v812_v11, %v809_v10 }
 0x2ea   : > { %v757_v13 = vpop.f32.mrb[12].mxu0  ;;  %1082 = vmatpush3.bf16.msra.mxu1 %v816_v12 }
 0x2eb   : > { %v758_v14 = vadd.f32 %v757_v13, %v708_v2  ;;  %v759_v15 = vpop.f32.mrb[13].mxu0 }
 0x2ec   : > { %v760_v0 = vadd.f32 %v759_v15, %v708_v2  ;;  %v761_v17 = vpop.f32.mrb[14].mxu0 }
 0x2ed   : > { %v762_v18 = vadd.f32 %v761_v17, %v713_v6  ;;  %v763_v19 = vpop.f32.mrb[15].mxu0  ;;  %1084 = vmatmul.mubr.msk.bf16.vlgmr.msra.gmra.mrb[16].mxu1 %vm823_vm2, %v813_v16  ;;  %v807_v21 = vmax.f32 %v758_v14, 0.0 }
 0x2ee   : > { %v764_v20 = vadd.f32 %v763_v19, %v713_v6  ;;  %v808_v23 = vmax.f32 %v760_v0, 0.0 }
 0x2ef   : > { %v810_v22 = vmax.f32 %v762_v18, 0.0 }
 0x2f0   : > { %v811_v24 = vmax.f32 %v764_v20, 0.0 }
 0x2f1   : > { %v814_v25 = vpack.c.bf16 %v810_v22, %v807_v21 }
 0x2f2   : > { %v815_v26 = vpack.c.bf16 %v811_v24, %v808_v23 }
 0x2f4   : > { %827 = vmatprep.subr.bf16.mxu0 %v815_v26 }
 0x2f5   : > { %828 = vmatpush1.bf16.msra.mxu0 %v814_v25 }
 0x2f8   : > { %1034 = vmatmul.mubr.msk.bf16.vlgmr.msra.gmra.mrb[16].mxu0 %vm823_vm2, %v813_v16 }
 0x3c0   : > { %v902_v28 = vpop.f32.mrb[16].mxu1 }
 0x3c1   : > { %v903_v29 = vadd.f32 %v902_v28, %v821_v27  ;;  %v1085_v30 = vpop.f32.mrb[17].mxu1 }
 0x3c2   : > { %v905_v31 = vpop.f32.mrb[18].mxu1 }
 0x3c3   : > { %v1038_v32 = vmul.f32 -1.442695, %v903_v29  ;;  %v1086_v33 = vpop.f32.mrb[19].mxu1 }
 0x3c5   : > { %1149 = vpow2.f32 %v1038_v32 }
 0x3cb   : > { %v861_v34 = vpop.f32.mrb[16].mxu0 }
 0x3cc   : > { %v862_v35 = vadd.f32 %v861_v34, %v821_v27  ;;  %v863_v36 = vpop.f32.mrb[17].mxu0 }
 0x3cd   : > { %v864_v37 = vadd.f32 %v863_v36, %v821_v27  ;;  %v865_v38 = vpop.f32.mrb[18].mxu0 }
 0x3ce   : > { %v1036_v39 = vmul.f32 -1.442695, %v862_v35  ;;  %v866_v40 = vpop.f32.mrb[19].mxu0 }
 0x3cf   : > { %v1037_v41 = vmul.f32 -1.442695, %v864_v37  ;;  %v1150_v42 = vpop.eup %1149 }
 0x3d0   : > { %1151 = vpow2.f32 %v1036_v39  ;;  %v919_v43 = vadd.f32 1.0, %v1150_v42 }
 0x3d1   : > { %1153 = vpow2.f32 %v1037_v41 }
 0x3d2   : > { %1155 = vrcp.f32 %v919_v43 }
 0x3da   : > { %v1152_v44 = vpop.eup %1151 }
 0x3db   : > { %v1154_v45 = vpop.eup %1153  ;;  %v917_v46 = vadd.f32 1.0, %v1152_v44 }
 0x3dc   : > { %v918_v47 = vadd.f32 1.0, %v1154_v45  ;;  %v1156_v48 = vpop.eup %1155 }
 0x3dd   : > { %1157 = vrcp.f32 %v917_v46  ;;  %928 = vst [vmem:[%s350_s23 + $0x10] sm:$0xff] %v1156_v48 }
 0x3de   : > { %1159 = vrcp.f32 %v918_v47 }
 0x3e7   : > { %v1158_v49 = vpop.eup %1157 }
 0x3e8   : > { %v1160_v50 = vpop.eup %1159  ;;  %926 = vst [vmem:[%s350_s23] sm:$0xff] %v1158_v49 }
 0x3e9   : > { %927 = vst [vmem:[%s350_s23 + $0x8] sm:$0xff] %v1160_v50 }
 0x3ea   : > { %1204 = shalt.err (!%p1201_p3)
}
 0x3eb   : > { %s1205_s24 = scalar_lea.hbm %s1501_s16, 384  ;;  %s1209_s23 = scalar_lea.hbm %s1554_s9, 768 }
 0x3ec   : > { %p1206_p5 = scmp.ne.s32.totalorder %s1501_s16, %s1205_s24  ;;  %p1210_p9 = scmp.lt.u32.totalorder %s1501_s16, %s1554_s9 }
 0x3ed   : > { %p1211_p0 = scmp.lt.u32.totalorder %s1209_s23, %s1205_s24  ;;  %p1213_p6 = scmp.lt.u32.totalorder %s1205_s24, %s1501_s16 }
 0x3ee   : > { %p1207_p7 = pnand %p1206_p5, %p1562_p11 }
 0x3ef   : > { %p1212_p2 = por %p1211_p0, %p1210_p9 }
 0x3f0   : > { %p1208_p8 = pneg %p1207_p7 }
 0x3f1   : > { %p1214_p12 = por %p1213_p6, %p1212_p2 }
 0x3f3   : > { %p1215_p13 = pnand %p1214_p12, %p1208_p8 }
 0x3f5   : > { %1218 = shalt.err (!%p1215_p13)
}
 0x3f6   : > { %1092 = dma.vmem_to_hbm [thread:$0]  (%p1562_p11), %s1503_s27, 384, %s1501_s16, %s930_s18  }
 0x3f7 PF: > { %s956_s14 = sand.u32 1, %s1245_s30   ;;  %p1563_p4 = scmp.ne.s32.totalorder %s1559_s21, 0 }
 0x3f8   : > { %p1564_p10 = scmp.ge.s32.totalorder %s1257_s12, 2  ;;  %s957_s17 = scalar_lea.sflag [#allocation4], %s956_s14 }
 0x3fa   : > { %p1099_p1 = pnand %p1564_p10, %p1563_p4 }
 0x3fc   : > { %1240 = dma.done.wait (!%p1099_p1), %s957_s17, 384  }
 0x3fd   : > { %1242 = vsyncadd (!%p1099_p1), %s957_s17, 4294966912  ;;  %s1565_s13 = sld [smem:[#allocation8_spill]]  ;;  %p22_p3 = scmp.ge.s32.totalorder %s1342_s15, 4  }
 0x3fe   : > { %s1566_s30 = smov %s1249_s10  ;;  %s1567_s10 = smov %s1253_s11 }
 0x3ff   : > { %s1569_s12 = smov %s1342_s15  ;;  %24 = sbr.rel (!%p22_p3) target bundleno = 5 (0x5), region = 101 }
 0x403   : > { %s1568_s11 = smov %s1565_s13 }
 0x406   :  { %962 = vsyncpa [#allocation3], 1 }
 0x407   :  { %964 = vsyncpa [#allocation3 + $0x1], 1 }
 0x408   :  { %965 = vsyncpa [#allocation4], 1 }
 0x409   :  { %967 = vsyncpa [#allocation4 + $0x1], 1 }

</bundles_post_ra>
